<compile_context>
chip_gen: v7x
topology: tpu7x:2x2x1
jax: 0.10.0
libtpu: 0.0.40
codegen_flags: <defaults>
</compile_context>

<pallas_src>
import jax
import jax.numpy as jnp
from jax.experimental import pallas as pl
from jax.experimental.pallas import tpu as pltpu


def _round_up(x, m):
    return (x + m - 1) // m * m


def mlp_kernel(x_ref, w1_ref, b1_ref, w2_ref, b2_ref, w3_ref, b3_ref, o_ref):
    # x arrives f32; cast to bf16 in-kernel (free under MXU), accumulate in f32.
    x = x_ref[...].astype(jnp.bfloat16)
    h1 = jnp.dot(x, w1_ref[...], preferred_element_type=jnp.float32) + b1_ref[...]
    h1 = jnp.maximum(h1, 0.0).astype(jnp.bfloat16)      # ReLU in f32, bf16 for layer 2
    h2 = jnp.dot(h1, w2_ref[...], preferred_element_type=jnp.float32) + b2_ref[...]
    h2 = jnp.maximum(h2, 0.0).astype(jnp.bfloat16)      # ReLU in f32, bf16 for layer 3
    out = jnp.dot(h2, w3_ref[...], preferred_element_type=jnp.float32) + b3_ref[...]
    o_ref[...] = out.astype(o_ref.dtype)                 # f32 output, no fc3 ReLU


def prepare_params(w1, b1, w2, b2, w3, b3):
    """One-time param prep (hoisted out of the forward): bf16 weights, f32 2-D biases."""
    return (
        w1.astype(jnp.bfloat16), b1.astype(jnp.float32).reshape(1, -1),
        w2.astype(jnp.bfloat16), b2.astype(jnp.float32).reshape(1, -1),
        w3.astype(jnp.bfloat16), b3.astype(jnp.float32).reshape(1, -1),
    )


def simple_mlp_forward(x, params, *, batch_tile=None):
    w1, b1, w2, b2, w3, b3 = params
    B, D_in = x.shape
    H1 = w1.shape[1]
    H2 = w2.shape[1]
    D_out = w3.shape[1]

    # --- batch tiling: biggest tile that fits, even split for v7x's 2 TCs ------
    if batch_tile is None:
        if B <= 512:
            batch_tile = _round_up(B, 16)                     # single grid step
        else:
            batch_tile = min(1024, _round_up(pl.cdiv(B, 2), 256))
    else:
        assert batch_tile % 8 == 0, "batch_tile must be a multiple of 8"

    B_pad = _round_up(B, batch_tile)
    if B_pad != B:
        x = jnp.pad(x, ((0, B_pad - B), (0, 0)))

    grid = (B_pad // batch_tile,)

    # Constant-index weight/bias blocks: DMA'd once, resident across all steps.
    wspec = lambda shape: pl.BlockSpec(shape, lambda i: (0, 0))

    flops = 2 * B_pad * (D_in * H1 + H1 * H2 + H2 * D_out)
    bytes_accessed = (
        B_pad * D_in * 4                                   # x (f32)
        + (D_in * H1 + H1 * H2 + H2 * D_out) * 2           # weights (bf16)
        + (H1 + H2 + D_out) * 4                            # biases (f32)
        + B_pad * D_out * 4                                # output (f32)
    )

    out_padded = pl.pallas_call(
        mlp_kernel,
        out_shape=jax.ShapeDtypeStruct((B_pad, D_out), jnp.float32),
        grid_spec=pltpu.PrefetchScalarGridSpec(
            num_scalar_prefetch=0,
            grid=grid,
            in_specs=[
                pl.BlockSpec((batch_tile, D_in), lambda i: (i, 0)),  # x tile (pipelined)
                wspec((D_in, H1)),                                   # w1
                wspec((1, H1)),                                      # b1
                wspec((H1, H2)),                                     # w2
                wspec((1, H2)),                                      # b2
                wspec((H2, D_out)),                                  # w3
                wspec((1, D_out)),                                   # b3
            ],
            out_specs=pl.BlockSpec((batch_tile, D_out), lambda i: (i, 0)),
        ),
        compiler_params=pltpu.CompilerParams(
            dimension_semantics=("parallel",),
            vmem_limit_bytes=32 * 1024 * 1024,
        ),
        cost_estimate=pl.CostEstimate(
            flops=flops, transcendentals=0, bytes_accessed=bytes_accessed),
    )(x, w1, b1, w2, b2, w3, b3)

    if B_pad != B:
        out_padded = out_padded[:B]
    return out_padded


def init_params(key, input_dim, output_dim):
    """Deterministic synthetic params matching nn.Linear shapes (stored transposed)."""
    dims = [(input_dim, 512), (512, 128), (128, output_dim)]
    params = []
    for (fan_in, fan_out) in dims:
        key, kw, kb = jax.random.split(key, 3)
        bound = 1.0 / jnp.sqrt(fan_in)  # same scale as PyTorch default Linear init
        w = jax.random.uniform(kw, (fan_in, fan_out), jnp.float32, -bound, bound)
        b = jax.random.uniform(kb, (fan_out,), jnp.float32, -bound, bound)
        params.extend([w, b])
    return params


def reference_forward(x, w1, b1, w2, b2, w3, b3):
    # Mirrors the kernel's precision strategy: bf16 matmul operands, f32 accumulation.
    xb = x.astype(jnp.bfloat16)
    h1 = jnp.dot(xb, w1.astype(jnp.bfloat16), preferred_element_type=jnp.float32) + b1
    h1 = jnp.maximum(h1, 0.0)
    h2 = jnp.dot(h1.astype(jnp.bfloat16), w2.astype(jnp.bfloat16),
                 preferred_element_type=jnp.float32) + b2
    h2 = jnp.maximum(h2, 0.0)
    return jnp.dot(h2.astype(jnp.bfloat16), w3.astype(jnp.bfloat16),
                   preferred_element_type=jnp.float32) + b3


if __name__ == "__main__":
    input_dim = 64
    output_dim = 16
    batch = 8

    key = jax.random.PRNGKey(0)
    key, kx = jax.random.split(key)
    x = jax.random.normal(kx, (batch, input_dim), jnp.float32)

    raw_params = init_params(key, input_dim, output_dim)
    params = prepare_params(*raw_params)          # one-time: bf16 weights, f32 2-D biases

    out = simple_mlp_forward(x, params)
    out = jax.block_until_ready(out)

    ref = reference_forward(x, *raw_params)
    assert out.shape == (batch, output_dim)
    assert out.dtype == jnp.float32
    assert jnp.allclose(out, ref, atol=1e-2, rtol=1e-2), "mismatch vs reference"

    print("KERNEL_OK")
</pallas_src>

<mosaic_0001>
module attributes {stable_mosaic.version = 11 : i64} {
  func.func @mlp_kernel(%arg0: i32, %arg1: memref<16x64xf32, #tpu.memory_space<vmem>>, %arg2: memref<64x512xbf16, #tpu.memory_space<vmem>>, %arg3: memref<1x512xf32, #tpu.memory_space<vmem>>, %arg4: memref<512x128xbf16, #tpu.memory_space<vmem>>, %arg5: memref<1x128xf32, #tpu.memory_space<vmem>>, %arg6: memref<128x16xbf16, #tpu.memory_space<vmem>>, %arg7: memref<1x16xf32, #tpu.memory_space<vmem>>, %arg8: memref<16x16xf32, #tpu.memory_space<vmem>>) attributes {dimension_semantics = [#tpu.dimension_semantics<parallel>], iteration_bounds = array<i64: 1>, scalar_prefetch = 0 : i64, scratch_operands = 0 : i64, tpu.core_type = #tpu.core_type<tc>, window_params = [{transform_indices = @transform_0, window_bounds = array<i64: 16, 64>}, {pipeline_mode = #tpu.pipeline_mode<synchronous>, transform_indices = @transform_1, window_bounds = array<i64: 64, 512>}, {pipeline_mode = #tpu.pipeline_mode<synchronous>, transform_indices = @transform_2, window_bounds = array<i64: 1, 512>}, {pipeline_mode = #tpu.pipeline_mode<synchronous>, transform_indices = @transform_3, window_bounds = array<i64: 512, 128>}, {pipeline_mode = #tpu.pipeline_mode<synchronous>, transform_indices = @transform_4, window_bounds = array<i64: 1, 128>}, {pipeline_mode = #tpu.pipeline_mode<synchronous>, transform_indices = @transform_5, window_bounds = array<i64: 128, 16>}, {pipeline_mode = #tpu.pipeline_mode<synchronous>, transform_indices = @transform_6, window_bounds = array<i64: 1, 16>}, {transform_indices = @transform_7, window_bounds = array<i64: 16, 16>}]} {
    %c0 = arith.constant 0 : index
    %c0_0 = arith.constant 0 : index
    %0 = vector.load %arg1[%c0, %c0_0] : memref<16x64xf32, #tpu.memory_space<vmem>>, vector<16x64xf32>
    %1 = arith.truncf %0 : vector<16x64xf32> to vector<16x64xbf16>
    %c0_1 = arith.constant 0 : index
    %c0_2 = arith.constant 0 : index
    %2 = vector.load %arg2[%c0_1, %c0_2] : memref<64x512xbf16, #tpu.memory_space<vmem>>, vector<64x512xbf16>
    %cst = arith.constant dense<0.000000e+00> : vector<16x512xf32>
    %3 = tpu.matmul %1, %2, %cst {dimension_numbers = #tpu.dot_dimension_numbers<[1], [0], [0], [1], [0, 0, 1, 1], [], []>} : vector<16x64xbf16>, vector<64x512xbf16>, vector<16x512xf32> -> vector<16x512xf32>
    %c0_3 = arith.constant 0 : index
    %c0_4 = arith.constant 0 : index
    %4 = vector.load %arg3[%c0_3, %c0_4] : memref<1x512xf32, #tpu.memory_space<vmem>>, vector<1x512xf32>
    %5 = vector.broadcast %4 : vector<1x512xf32> to vector<16x512xf32>
    %6 = arith.addf %3, %5 : vector<16x512xf32>
    %cst_5 = arith.constant 0.000000e+00 : f32
    %7 = vector.broadcast %cst_5 : f32 to vector<16x512xf32>
    %8 = arith.maximumf %6, %7 : vector<16x512xf32>
    %9 = arith.truncf %8 : vector<16x512xf32> to vector<16x512xbf16>
    %c0_6 = arith.constant 0 : index
    %c0_7 = arith.constant 0 : index
    %10 = vector.load %arg4[%c0_6, %c0_7] : memref<512x128xbf16, #tpu.memory_space<vmem>>, vector<512x128xbf16>
    %cst_8 = arith.constant dense<0.000000e+00> : vector<16x128xf32>
    %11 = tpu.matmul %9, %10, %cst_8 {dimension_numbers = #tpu.dot_dimension_numbers<[1], [0], [0], [1], [0, 0, 1, 1], [], []>} : vector<16x512xbf16>, vector<512x128xbf16>, vector<16x128xf32> -> vector<16x128xf32>
    %c0_9 = arith.constant 0 : index
    %c0_10 = arith.constant 0 : index
    %12 = vector.load %arg5[%c0_9, %c0_10] : memref<1x128xf32, #tpu.memory_space<vmem>>, vector<1x128xf32>
    %13 = vector.broadcast %12 : vector<1x128xf32> to vector<16x128xf32>
    %14 = arith.addf %11, %13 : vector<16x128xf32>
    %cst_11 = arith.constant 0.000000e+00 : f32
    %15 = vector.broadcast %cst_11 : f32 to vector<16x128xf32>
    %16 = arith.maximumf %14, %15 : vector<16x128xf32>
    %17 = arith.truncf %16 : vector<16x128xf32> to vector<16x128xbf16>
    %c0_12 = arith.constant 0 : index
    %c0_13 = arith.constant 0 : index
    %18 = vector.load %arg6[%c0_12, %c0_13] : memref<128x16xbf16, #tpu.memory_space<vmem>>, vector<128x16xbf16>
    %cst_14 = arith.constant dense<0.000000e+00> : vector<16x16xf32>
    %19 = tpu.matmul %17, %18, %cst_14 {dimension_numbers = #tpu.dot_dimension_numbers<[1], [0], [0], [1], [0, 0, 1, 1], [], []>} : vector<16x128xbf16>, vector<128x16xbf16>, vector<16x16xf32> -> vector<16x16xf32>
    %c0_15 = arith.constant 0 : index
    %c0_16 = arith.constant 0 : index
    %20 = vector.load %arg7[%c0_15, %c0_16] : memref<1x16xf32, #tpu.memory_space<vmem>>, vector<1x16xf32>
    %21 = vector.broadcast %20 : vector<1x16xf32> to vector<16x16xf32>
    %22 = arith.addf %19, %21 : vector<16x16xf32>
    %c0_17 = arith.constant 0 : index
    %c0_18 = arith.constant 0 : index
    %23 = vector.load %arg8[%c0_17, %c0_18] : memref<16x16xf32, #tpu.memory_space<vmem>>, vector<16x16xf32>
    tpu.vector_store %arg8[%c0_17, %c0_18], %22 {strides = array<i32>} : memref<16x16xf32, #tpu.memory_space<vmem>>, vector<16x16xf32>,
    return
  }
  func.func @transform_0(%arg0: i32) -> (i32, i32) {
    %c0_i32 = arith.constant 0 : i32
    %c0_i32_0 = arith.constant 0 : i32
    return %arg0, %c0_i32 : i32, i32
  }
  func.func @transform_1(%arg0: i32) -> (i32, i32) {
    %c0_i32 = arith.constant 0 : i32
    %c0_i32_0 = arith.constant 0 : i32
    %c0_i32_1 = arith.constant 0 : i32
    return %c0_i32, %c0_i32_0 : i32, i32
  }
  func.func @transform_2(%arg0: i32) -> (i32, i32) {
    %c0_i32 = arith.constant 0 : i32
    %c0_i32_0 = arith.constant 0 : i32
    %c0_i32_1 = arith.constant 0 : i32
    return %c0_i32, %c0_i32_0 : i32, i32
  }
  func.func @transform_3(%arg0: i32) -> (i32, i32) {
    %c0_i32 = arith.constant 0 : i32
    %c0_i32_0 = arith.constant 0 : i32
    %c0_i32_1 = arith.constant 0 : i32
    return %c0_i32, %c0_i32_0 : i32, i32
  }
  func.func @transform_4(%arg0: i32) -> (i32, i32) {
    %c0_i32 = arith.constant 0 : i32
    %c0_i32_0 = arith.constant 0 : i32
    %c0_i32_1 = arith.constant 0 : i32
    return %c0_i32, %c0_i32_0 : i32, i32
  }
  func.func @transform_5(%arg0: i32) -> (i32, i32) {
    %c0_i32 = arith.constant 0 : i32
    %c0_i32_0 = arith.constant 0 : i32
    %c0_i32_1 = arith.constant 0 : i32
    return %c0_i32, %c0_i32_0 : i32, i32
  }
  func.func @transform_6(%arg0: i32) -> (i32, i32) {
    %c0_i32 = arith.constant 0 : i32
    %c0_i32_0 = arith.constant 0 : i32
    %c0_i32_1 = arith.constant 0 : i32
    return %c0_i32, %c0_i32_0 : i32, i32
  }
  func.func @transform_7(%arg0: i32) -> (i32, i32) {
    %c0_i32 = arith.constant 0 : i32
    %c0_i32_0 = arith.constant 0 : i32
    return %arg0, %c0_i32 : i32, i32
  }
}

</mosaic_0001>

<bundles_post_ra>
// kernel: tpu_custom_call.1
= control target key start
LH: loop header
LB: loop body
LE: loop exit
PB: predicated region body
PF: predicated region fallthrough
CT: control target
= control target key end

     0   :  { %12 = vsyncpa [#allocation3], 0  ;;  %s1179_s0 = inlined_call_operand.vmem [shape: f32[16,64], index: 0, kind: input, shape index: {}]   ;;  %s1180_s1 = inlined_call_operand.hbm [shape: bf16[64,512], index: 1, kind: input, shape index: {}]   ;;  %s1181_s2 = inlined_call_operand.vmem [shape: f32[1,512], index: 2, kind: input, shape index: {}]   ;;  %s1182_s3 = inlined_call_operand.hbm [shape: bf16[512,128], index: 3, kind: input, shape index: {}]   ;;  %s1183_s4 = inlined_call_operand.vmem [shape: f32[1,128], index: 4, kind: input, shape index: {}]   ;;  %s1184_s5 = inlined_call_operand.vmem [shape: bf16[128,16], index: 5, kind: input, shape index: {}]   ;;  %s1185_s6 = inlined_call_operand.vmem [shape: f32[1,16], index: 6, kind: input, shape index: {}]   ;;  %s1186_s7 = inlined_call_operand.hbm [shape: f32[16,16], index: 7, kind: output, shape index: {}]  }
   0x1   :  { %13 = vsyncpa [#allocation6], 0 }
   0x2   :  { %14 = vsyncpa [#allocation4], 0  ;;  %s1041_s24 = smov [#allocation2]   ;;  %s969_s28 = scalar_lea.hbm %s1180_s1, 2048 }
   0x3   :  { %s22_s25 = sshll.u32 %s1041_s24, 4  ;;  %p970_p0 = scmp.ne.s32.totalorder %s1180_s1, %s969_s28  ;;  %s23_s25 = int_to_ptr.vmem [resolvable:$true] %s22_s25 }
   0x4   :  { %p973_p1 = scmp.lt.u32.totalorder %s969_s28, %s1180_s1 }
   0x6   :  { %p975_p2 = pnand %p973_p1, %p970_p0 }
   0x8   :  { %978 = shalt.err (!%p975_p2)
}
   0x9   :  { %s979_s10 = scalar_lea.vmem %s23_s25, 2048  ;;  %p984_p4 = scmp.lt.s32.totalorder %s23_s25, %s23_s25 }
   0xa   :  { %p980_p3 = scmp.ne.s32.totalorder %s23_s25, %s979_s10  ;;  %p985_p5 = scmp.lt.s32.totalorder %s979_s10, %s979_s10 }
   0xc   :  { %p986_p6 = por %p985_p5, %p984_p4 }
   0xe   :  { %p987_p7 = pnand %p986_p6, %p980_p3 }
  0x10   :  { %990 = shalt.err (!%p987_p7)
}
  0x11   :  { %s1042_s11 = smov 256   ;;  %s1043_s12 = smov 16  }
  0x12   :  { %28 = dma.hbm_to_vmem [thread:$0]  %s1180_s1, 2048, %s23_s25, [#allocation3], %s1042_s11, %s1042_s11, %s1043_s12  }
  0x13   :  { %s1044_s15 = smov [#allocation5]   ;;  %s991_s19 = scalar_lea.hbm %s1182_s3, 4096 }
  0x14   :  { %s36_s16 = sshll.u32 %s1044_s15, 4  ;;  %p992_p8 = scmp.ne.s32.totalorder %s1182_s3, %s991_s19  ;;  %s37_s16 = int_to_ptr.vmem [resolvable:$true] %s36_s16 }
  0x15   :  { %p995_p9 = scmp.lt.u32.totalorder %s991_s19, %s1182_s3 }
  0x17   :  { %p997_p10 = pnand %p995_p9, %p992_p8 }
  0x19   :  { %1000 = shalt.err (!%p997_p10)
}
  0x1a   :  { %s1001_s24 = scalar_lea.vmem %s37_s16, 4096  ;;  %p1006_p12 = scmp.lt.s32.totalorder %s37_s16, %s37_s16 }
  0x1b   :  { %p1002_p11 = scmp.ne.s32.totalorder %s37_s16, %s1001_s24  ;;  %p1007_p13 = scmp.lt.s32.totalorder %s1001_s24, %s1001_s24 }
  0x1d   :  { %p1008_p0 = por %p1007_p13, %p1006_p12 }
  0x1f   :  { %p1009_p1 = pnand %p1008_p0, %p1002_p11 }
  0x21   :  { %1012 = shalt.err (!%p1009_p1)
}
  0x22   :  { %s1045_s1 = smov 64   ;;  %s1046_s25 = smov 4  }
  0x23   :  { %42 = dma.hbm_to_vmem [thread:$0]  %s1182_s3, 4096, %s37_s16, [#allocation6], %s1045_s1, %s1045_s1, %s1046_s25  }
  0x24   :  { %1035 = dma.done.wait [#allocation3], 2048  }
  0x25   :  { %1036 = vsyncadd [#allocation3], 4294965248 }
  0x26   :  { %1037 = dma.done.wait [#allocation6], 4096  }
  0x27   :  { %1038 = vsyncadd [#allocation6], 4294963200  ;;  %v1047_v0 = vmov 0   ;;  %v905_v1 = vld [vmem:[#allocation2 + $0x4] ss:$16 sps:$4 sm:$0xff]   ;;  %v57_v10 = vld [vmem:[%s1179_s0 + $0x8] sm:$0xff]  ;;  %v77_v53 = vlaneseq }
  0x28   :  { %213 = vmatprep.mubr.bf16.mxu1 %v1047_v0  ;;  %v907_v2 = vld [vmem:[#allocation2] ss:$16 sps:$4 sm:$0xff]   ;;  %181 = vmatprep.subr.bf16.mxu1 %v905_v1  ;;  %v908_v3 = vld [vmem:[#allocation2 + $0x24] ss:$16 sps:$4 sm:$0xff]   ;;  %v919_v11 = vld [vmem:[#allocation2 + $0xc] ss:$16 sps:$4 sm:$0xff]  }
  0x29   :  { %182 = vmatpush1.bf16.msra.mxu1 %v907_v2  ;;  %v910_v4 = vld [vmem:[#allocation2 + $0x20] ss:$16 sps:$4 sm:$0xff]   ;;  %v911_v5 = vld [vmem:[#allocation2 + $0x44] ss:$16 sps:$4 sm:$0xff]   ;;  %v917_v13 = vld [vmem:[#allocation2 + $0x8] ss:$16 sps:$4 sm:$0xff]  }
  0x2a   :  { %183 = vmatprep.subr.bf16.mxu1 %v908_v3  ;;  %v913_v6 = vld [vmem:[#allocation2 + $0x40] ss:$16 sps:$4 sm:$0xff]   ;;  %v914_v7 = vld [vmem:[#allocation2 + $0x64] ss:$16 sps:$4 sm:$0xff]   ;;  %vm177_vm0 = vcmask 523264   ;;  %v931_v16 = vld [vmem:[#allocation5 + $0x48] sm:$0xff]  }
  0x2b   :  { %v916_v8 = vld [vmem:[#allocation2 + $0x60] ss:$16 sps:$4 sm:$0xff]   ;;  %v922_v17 = vld [vmem:[#allocation2 + $0x2c] ss:$16 sps:$4 sm:$0xff]   ;;  %v920_v20 = vld [vmem:[#allocation2 + $0x28] ss:$16 sps:$4 sm:$0xff]  }
  0x2c   :  { %v56_v9 = vld [vmem:[%s1179_s0] sm:$0xff]  ;;  %v932_v18 = vld [vmem:[#allocation5 + $0x8] sm:$0xff]   ;;  %v933_v19 = vld [vmem:[#allocation5 + $0x50] sm:$0xff]   ;;  %v1048_v52 = vmov 0.0   ;;  %v78_v54 = vshrl.u32 %v77_v53, 7  ;;  %vm1049_vm1 = vmmov 0  }
  0x2d   :  { %184 = vmatpush1.bf16.msra.mxu1 %v910_v4  ;;  %v929_v12 = vld [vmem:[#allocation5 + $0x40] sm:$0xff]   ;;  %v58_v15 = vpack.c.bf16 %v57_v10, %v56_v9  ;;  %v925_v21 = vld [vmem:[#allocation2 + $0x4c] ss:$16 sps:$4 sm:$0xff]   ;;  %v934_v22 = vld [vmem:[#allocation5 + $0x10] sm:$0xff]   ;;  %s1050_s26 = smov [#allocation7]   ;;  %vm739_vm2 = vcmask 130048  }
  0x2e   :  { %185 = vmatprep.subr.bf16.mxu1 %v911_v5  ;;  %v930_v14 = vld [vmem:[#allocation5] sm:$0xff]   ;;  %820 = vmatprep.subr.bf16.mxu0 %v929_v12  ;;  %v935_v23 = vld [vmem:[#allocation5 + $0x58] sm:$0xff]   ;;  %v941_v31 = vld [vmem:[#allocation5 + $0x68] sm:$0xff]   ;;  %v79_v55 = vsub.s32 0, %v78_v54  ;;  %v83_v57 = vsub.s32 1, %v78_v54  ;;  %v91_v12 = vsub.s32 3, %v78_v54 }
  0x2f   :  { %821 = vmatpush3.bf16.msra.mxu0 %v930_v14  ;;  %v923_v24 = vld [vmem:[#allocation2 + $0x48] ss:$16 sps:$4 sm:$0xff]   ;;  %v928_v25 = vld [vmem:[#allocation2 + $0x6c] ss:$16 sps:$4 sm:$0xff]   ;;  %v937_v28 = vld [vmem:[#allocation5 + $0x60] sm:$0xff]  }
  0x30   :  { %822 = vmatprep.subr.bf16.mxu0 %v931_v16  ;;  %v936_v26 = vld [vmem:[#allocation5 + $0x18] sm:$0xff]   ;;  %v938_v29 = vld [vmem:[#allocation5 + $0xc0] sm:$0xff]   ;;  %v942_v33 = vld [vmem:[#allocation5 + $0xc8] sm:$0xff]  }
  0x31   :  { %186 = vmatpush1.bf16.msra.mxu1 %v913_v6  ;;  %v926_v27 = vld [vmem:[#allocation2 + $0x68] ss:$16 sps:$4 sm:$0xff]   ;;  %v939_v30 = vld [vmem:[#allocation5 + $0x20] sm:$0xff]   ;;  %v945_v36 = vld [vmem:[#allocation5 + $0x70] sm:$0xff]  }
  0x32   :  { %187 = vmatprep.subr.bf16.mxu1 %v914_v7  ;;  %v940_v32 = vld [vmem:[#allocation5 + $0x80] sm:$0xff]   ;;  %v943_v34 = vld [vmem:[#allocation5 + $0x28] sm:$0xff]   ;;  %v946_v37 = vld [vmem:[#allocation5 + $0xd0] sm:$0xff]  }
  0x33   :  { %823 = vmatpush3.bf16.msra.mxu0 %v932_v18  ;;  %v944_v35 = vld [vmem:[#allocation5 + $0x88] sm:$0xff]   ;;  %v947_v38 = vld [vmem:[#allocation5 + $0x30] sm:$0xff]   ;;  %v949_v40 = vld [vmem:[#allocation5 + $0x78] sm:$0xff]  }
  0x34   :  { %824 = vmatprep.subr.bf16.mxu0 %v933_v19  ;;  %v948_v39 = vld [vmem:[#allocation5 + $0x90] sm:$0xff]   ;;  %v950_v41 = vld [vmem:[#allocation5 + $0xd8] sm:$0xff]   ;;  %v953_v44 = vld [vmem:[#allocation5 + $0xe0] sm:$0xff]  }
  0x35   :  { %188 = vmatpush1.bf16.msra.mxu1 %v916_v8  ;;  %v951_v42 = vld [vmem:[#allocation5 + $0x38] sm:$0xff]   ;;  %v954_v45 = vld [vmem:[#allocation5 + $0xa0] sm:$0xff]   ;;  %v955_v46 = vld [vmem:[#allocation5 + $0xe8] sm:$0xff]  }
  0x36   :  { %224 = vmatprep.subr.bf16.mxu1 %v919_v11  ;;  %v952_v43 = vld [vmem:[#allocation5 + $0x98] sm:$0xff]   ;;  %v956_v47 = vld [vmem:[#allocation5 + $0xa8] sm:$0xff]   ;;  %v957_v48 = vld [vmem:[#allocation5 + $0xf0] sm:$0xff]   ;;  %v87_v11 = vsub.s32 2, %v78_v54 }
  0x37   :  { %825 = vmatpush3.bf16.msra.mxu0 %v934_v22  ;;  %v958_v49 = vld [vmem:[#allocation5 + $0xb0] sm:$0xff]   ;;  %v959_v50 = vld [vmem:[#allocation5 + $0xf8] sm:$0xff]   ;;  %v75_v56 = vld [vmem:[%s1181_s2] sm:$0xf] }
  0x38   :  { %776 = vmatmul.mubr.msk.bf16.vlgmr.msra.gmra.mrb[0].mxu1 %vm177_vm0, %v58_v15  ;;  %826 = vmatprep.subr.bf16.mxu0 %v935_v23  ;;  %v960_v51 = vld [vmem:[#allocation5 + $0xb8] sm:$0xff]   ;;  %v80_v58 = vrot.slane %v75_v56, %v79_v55  ;;  %v84_v59 = vrot.slane %v75_v56, %v83_v57  ;;  %v961_v10 = vld [vmem:[%s1184_s5] sm:$0xff]   ;;  %v92_v14 = vrot.slane %v75_v56, %v91_v12 }
  0x39   :  { %225 = vmatpush1.bf16.msra.mxu1 %v917_v13  ;;  %256 = vmatprep.mubr.bf16.mxu1 %v1047_v0  ;;  %v88_v13 = vrot.slane %v75_v56, %v87_v11  ;;  %v811_v56 = vld [vmem:[%s1185_s6] ss:$0 sm:$0xff] }
  0x3a   :  { %226 = vmatprep.subr.bf16.mxu1 %v922_v17 }
  0x3b   :  { %827 = vmatpush3.bf16.msra.mxu0 %v936_v26 }
  0x3c   :  { %828 = vmatprep.subr.bf16.mxu0 %v937_v28 }
  0x3d   :  { %227 = vmatpush1.bf16.msra.mxu1 %v920_v20 }
  0x3e   :  { %228 = vmatprep.subr.bf16.mxu1 %v925_v21 }
  0x3f   :  { %829 = vmatpush3.bf16.msra.mxu0 %v939_v30  ;;  %v963_v30 = vld [vmem:[%s1184_s5 + $0x10] sm:$0xff]  }
  0x40   :  { %830 = vmatprep.subr.bf16.mxu0 %v941_v31  ;;  %v964_v31 = vld [vmem:[%s1184_s5 + $0x18] sm:$0xff]  }
  0x41   :  { %229 = vmatpush1.bf16.msra.mxu1 %v923_v24 }
  0x42   :  { %230 = vmatprep.subr.bf16.mxu1 %v928_v25 }
  0x43   :  { %831 = vmatpush3.bf16.msra.mxu0 %v943_v34  ;;  %v967_v34 = vld [vmem:[%s1184_s5 + $0x30] sm:$0xff]  }
  0x44   :  { %832 = vmatprep.subr.bf16.mxu0 %v945_v36 }
  0x45   :  { %231 = vmatpush1.bf16.msra.mxu1 %v926_v27 }
  0x46   :  { %842 = vmatprep.subr.bf16.mxu1 %v938_v29  ;;  %v962_v29 = vld [vmem:[%s1184_s5 + $0x8] sm:$0xff]  }
  0x47   :  { %833 = vmatpush3.bf16.msra.mxu0 %v947_v38 }
  0x48   :  { %777 = vmatmul.mubr.msk.bf16.vlgmr.msra.gmra.mrb[4].mxu1 %vm177_vm0, %v58_v15  ;;  %834 = vmatprep.subr.bf16.mxu0 %v949_v40 }
  0x49   :  { %843 = vmatpush3.bf16.msra.mxu1 %v940_v32  ;;  %v965_v32 = vld [vmem:[%s1184_s5 + $0x20] sm:$0xff]  }
  0x4a   :  { %844 = vmatprep.subr.bf16.mxu1 %v942_v33  ;;  %v966_v33 = vld [vmem:[%s1184_s5 + $0x28] sm:$0xff]  }
  0x4b   :  { %835 = vmatpush3.bf16.msra.mxu0 %v951_v42  ;;  %v778_v42 = vld [vmem:[%s1183_s4] ss:$0 sm:$0xff]  ;;  %s747_s4 = sshll.u32 %s1050_s26, 4  ;;  %s748_s4 = int_to_ptr.vmem [resolvable:$true] %s747_s4 }
  0x4c   :  { %873 = vmatprep.subr.bf16.mxu0 %v1048_v52  ;;  %s1013_s27 = scalar_lea.vmem %s748_s4, 256  ;;  %p1018_p3 = scmp.lt.s32.totalorder %s748_s4, %s748_s4 }
  0x4d   :  { %845 = vmatpush3.bf16.msra.mxu1 %v944_v35  ;;  %v968_v35 = vld [vmem:[%s1184_s5 + $0x38] sm:$0xff]   ;;  %p1014_p2 = scmp.ne.s32.totalorder %s748_s4, %s1013_s27  ;;  %p1019_p4 = scmp.lt.s32.totalorder %s1013_s27, %s1013_s27 }
  0x4e   :  { %846 = vmatprep.subr.bf16.mxu1 %v946_v37 }
  0x4f   :  { %p1020_p5 = por %p1019_p4, %p1018_p3 }
  0x51   :  { %847 = vmatpush3.bf16.msra.mxu1 %v948_v39  ;;  %p1021_p6 = pnand %p1020_p5, %p1014_p2 }
  0x52   :  { %848 = vmatprep.subr.bf16.mxu1 %v950_v41 }
  0x55   :  { %849 = vmatpush3.bf16.msra.mxu1 %v952_v43 }
  0x56   :  { %850 = vmatprep.subr.bf16.mxu1 %v953_v44 }
  0x59   :  { %851 = vmatpush3.bf16.msra.mxu1 %v954_v45 }
  0x5a   :  { %852 = vmatprep.subr.bf16.mxu1 %v955_v46 }
  0x5d   :  { %853 = vmatpush3.bf16.msra.mxu1 %v956_v47 }
  0x5e   :  { %854 = vmatprep.subr.bf16.mxu1 %v957_v48 }
  0x61   :  { %855 = vmatpush3.bf16.msra.mxu1 %v958_v49 }
  0x62   :  { %856 = vmatprep.subr.bf16.mxu1 %v959_v50 }
  0x65   :  { %857 = vmatpush3.bf16.msra.mxu1 %v960_v51 }
 0x10b   :  { %v215_v60 = vpop.f32.mrb[0].mxu1 }
 0x10c   :  { %v216_v61 = vadd.f32 %v215_v60, %v80_v58  ;;  %v217_v62 = vpop.f32.mrb[1].mxu1 }
 0x10d   :  { %v218_v63 = vadd.f32 %v217_v62, %v84_v59  ;;  %v219_v0 = vpop.f32.mrb[2].mxu1 }
 0x10e   :  { %v267_v1 = vmax.f32 %v216_v61, 0.0  ;;  %v220_v2 = vadd.f32 %v219_v0, %v80_v58  ;;  %v221_v3 = vpop.f32.mrb[3].mxu1 }
 0x10f   :  { %v222_v4 = vadd.f32 %v221_v3, %v84_v59  ;;  %v268_v6 = vmax.f32 %v218_v63, 0.0 }
 0x110   :  { %v271_v5 = vmax.f32 %v220_v2, 0.0 }
 0x111   :  { %v272_v7 = vmax.f32 %v222_v4, 0.0 }
 0x112   :  { %v275_v8 = vpack.c.bf16 %v271_v5, %v267_v1 }
 0x113   :  { %v276_v9 = vpack.c.bf16 %v272_v7, %v268_v6 }
 0x115   :  { %574 = vmatprep.mubr.bf16.mxu0 %v276_v9 }
 0x116   :  { %575 = vmatmul.mubr.bf16.vlgmr.msra.gmra.mrb[0].mxu0 %v275_v8 }
 0x117   :  { %874 = vmatpush3.bf16.msra.mxu0 %v961_v10  ;;  %889 = vmatprep.mubr.msk.bf16.mxu0 %vm1049_vm1, %v1048_v52 }
 0x118   :  { %875 = vmatprep.subr.bf16.mxu0 %v1048_v52 }
 0x11b   :  { %v258_v15 = vpop.f32.mrb[4].mxu1  ;;  %876 = vmatpush3.bf16.msra.mxu0 %v962_v29 }
 0x11c   :  { %v259_v16 = vadd.f32 %v258_v15, %v88_v13  ;;  %v260_v17 = vpop.f32.mrb[5].mxu1  ;;  %877 = vmatprep.subr.bf16.mxu0 %v1048_v52 }
 0x11d   :  { %v261_v18 = vadd.f32 %v260_v17, %v92_v14  ;;  %v262_v19 = vpop.f32.mrb[6].mxu1 }
 0x11e   :  { %v263_v20 = vadd.f32 %v262_v19, %v88_v13  ;;  %v264_v21 = vpop.f32.mrb[7].mxu1  ;;  %v269_v23 = vmax.f32 %v259_v16, 0.0 }
 0x11f   :  { %v265_v22 = vadd.f32 %v264_v21, %v92_v14  ;;  %v270_v25 = vmax.f32 %v261_v18, 0.0  ;;  %878 = vmatpush3.bf16.msra.mxu0 %v963_v30 }
 0x120   :  { %v273_v24 = vmax.f32 %v263_v20, 0.0  ;;  %879 = vmatprep.subr.bf16.mxu0 %v1048_v52 }
 0x121   :  { %v274_v26 = vmax.f32 %v265_v22, 0.0 }
 0x122   :  { %v277_v27 = vpack.c.bf16 %v273_v24, %v269_v23 }
 0x123   :  { %v278_v28 = vpack.c.bf16 %v274_v26, %v270_v25  ;;  %880 = vmatpush3.bf16.msra.mxu0 %v964_v31 }
 0x124   :  { %881 = vmatprep.subr.bf16.mxu0 %v1048_v52 }
 0x125   :  { %615 = vmatprep.mubr.bf16.mxu1 %v278_v28 }
 0x126   :  { %616 = vmatmul.mubr.bf16.vlgmr.msra.gmra.mrb[8].mxu1 %v277_v27 }
 0x127   :  { %882 = vmatpush3.bf16.msra.mxu0 %v965_v32 }
 0x128   :  { %883 = vmatprep.subr.bf16.mxu0 %v1048_v52 }
 0x12b   :  { %884 = vmatpush3.bf16.msra.mxu0 %v966_v33 }
 0x12c   :  { %885 = vmatprep.subr.bf16.mxu0 %v1048_v52 }
 0x12f   :  { %886 = vmatpush3.bf16.msra.mxu0 %v967_v34 }
 0x130   :  { %887 = vmatprep.subr.bf16.mxu0 %v1048_v52 }
 0x133   :  { %888 = vmatpush3.bf16.msra.mxu0 %v968_v35 }
 0x1e9   :  { %v836_v36 = vpop.f32.mrb[0].mxu0 }
 0x1ea   :  { %v837_v37 = vpop.f32.mrb[1].mxu0 }
 0x1eb   :  { %v838_v38 = vadd.f32 %v837_v37, %v836_v36  ;;  %v839_v39 = vpop.f32.mrb[2].mxu0 }
 0x1ec   :  { %v840_v40 = vpop.f32.mrb[3].mxu0 }
 0x1ed   :  { %v841_v41 = vadd.f32 %v840_v40, %v839_v39  ;;  %v577_v45 = vadd.f32 %v838_v38, %v778_v42 }
 0x1ef   :  { %v580_v49 = vadd.f32 %v841_v41, %v778_v42 }
 0x1f9   :  { %v858_v43 = vpop.f32.mrb[8].mxu1 }
 0x1fa   :  { %v859_v44 = vpop.f32.mrb[9].mxu1 }
 0x1fb   :  { %v860_v46 = vadd.f32 %v859_v44, %v858_v43  ;;  %v861_v47 = vpop.f32.mrb[10].mxu1 }
 0x1fc   :  { %v862_v48 = vpop.f32.mrb[11].mxu1 }
 0x1fd   :  { %v618_v50 = vadd.f32 %v860_v46, %v577_v45  ;;  %v863_v51 = vadd.f32 %v862_v48, %v861_v47 }
 0x1ff   :  { %v621_v52 = vadd.f32 %v863_v51, %v580_v49  ;;  %v624_v53 = vmax.f32 %v618_v50, 0.0 }
 0x201   :  { %v625_v54 = vmax.f32 %v621_v52, 0.0 }
 0x203   :  { %v626_v55 = vpack.c.bf16 %v625_v54, %v624_v53 }
 0x205   :  { %890 = vmatmul.mubr.bf16.vlgmr.msra.gmra.mrb[4].mxu0 %v626_v55 }
 0x2d8   :  { %v732_v57 = vpop.f32.mrb[4].mxu0 }
 0x2d9   :  { %v733_v58 = vadd.f32 %v811_v56, %v732_v57  ;;  %v891_v59 = vpop.f32.mrb[5].mxu0 }
 0x2da   :  { %v735_v60 = vpop.f32.mrb[6].mxu0 }
 0x2db   :  { %740 = vst.msk [vmem:[#allocation7] sm:$0xff] %vm739_vm2, %v733_v58  ;;  %v736_v61 = vadd.f32 %v811_v56, %v735_v60  ;;  %v892_v62 = vpop.f32.mrb[7].mxu0 }
 0x2dd   :  { %741 = vst.msk [vmem:[#allocation7 + $0x8] sm:$0xff] %vm739_vm2, %v736_v61 }
 0x2de   :  { %1024 = shalt.err (!%p1021_p6)
}
 0x2df   :  { %s1025_s28 = scalar_lea.hbm %s1186_s7, 256 }
 0x2e0   :  { %p1026_p7 = scmp.ne.s32.totalorder %s1186_s7, %s1025_s28  ;;  %p1029_p8 = scmp.lt.u32.totalorder %s1025_s28, %s1186_s7 }
 0x2e2   :  { %p1031_p9 = pnand %p1029_p8, %p1026_p7 }
 0x2e4   :  { %1034 = shalt.err (!%p1031_p9)
}
 0x2e5   :  { %s1051_s9 = smov 128   ;;  %s1052_s10 = smov 8  }
 0x2e6   :  { %753 = dma.vmem_to_hbm [thread:$0]  %s748_s4, 256, %s1186_s7, [#allocation4], %s1051_s9, %s1051_s9, %s1052_s10  }
 0x2e7   :  { %1039 = dma.done.wait [#allocation4], 256  }
 0x2e8   :  { %1040 = vsyncadd [#allocation4], 4294967040 }
 0x2e9   :  { %757 = vsyncpa [#allocation3], 1 }
 0x2ea   :  { %758 = vsyncpa [#allocation6], 1 }
 0x2eb   :  { %759 = vsyncpa [#allocation4], 1 }

</bundles_post_ra>
